<compile_context>
chip_gen: v6e
topology: v6e:2x2x1
jax: 0.10.0
libtpu: 0.0.40
codegen_flags: <defaults>
</compile_context>

<pallas_src>
import jax
import jax.numpy as jnp
from jax.experimental import pallas as pl
from jax.experimental.pallas import tpu as pltpu


def _round_up(x, m):
    return ((x + m - 1) // m) * m


def _plan(n_nodes, num_rel, fout_pad):
    """Generation-aware tiling plan.

    Returns (n_pad, tm, vmem_limit_bytes, a_buffer_count): node padding (multiple
    of 128), dst-tile size, VMEM limit and adjacency-stream pipeline depth, all
    derived from the actual chip's VMEM capacity with resident arrays budgeted.
    """
    n_pad = _round_up(n_nodes, 128)
    try:
        cap = int(pltpu.get_tpu_info().vmem_capacity_bytes)
    except Exception:  # no TPU info available -> assume smallest (v7x-sized) VMEM
        cap = 64 * 1024 * 1024

    vmem_limit = min(int(cap * 0.85), cap - (8 << 20))   # ~54 MiB on v7x, ~108 MiB on v5e/v6e
    budget = int(cap * 0.70)                             # headroom for compiler scratch
    a_bufs = 3 if cap >= (96 << 20) else 2               # deeper A pipeline on 128 MiB parts

    xw_resident = num_rel * n_pad * fout_pad * 2         # bf16, single-buffered (Buffered(1))
    tm = 32
    for cand in (512, 256, 128, 64, 32):                 # multiples of 32 (int8 sublane pack)
        if cand * 2 > n_pad:                             # keep >= 2 dst tiles (megacore / v7x TC1)
            continue
        if n_pad % cand:
            continue
        a_stream = a_bufs * cand * n_pad * 1             # int8 adjacency tiles
        out_blk = 2 * cand * fout_pad * 2 + cand * fout_pad * 4   # bf16 out blocks + f32 acc
        small = 2 * cand * 4 + fout_pad * 4              # dst-scale tiles + summed bias
        if xw_resident + a_stream + out_blk + small <= budget:
            tm = cand
            break
    return n_pad, tm, vmem_limit, a_bufs


def _rgcn_aggregate(adj_i8, xw_scaled, in_scale, b_sum, *, apply_relu, tm,
                    vmem_limit, a_bufs, compute_dtype):
    """Fused aggregation for one layer:
         out[d] = sum_r in_scale[r, d] * (A_r[d, :] @ XW_scaled[r]) + sum_r b_r
       (optionally followed by ReLU), emitted in `compute_dtype`.

    adj_i8:    (R, Np, Np)   binary adjacency, int8 (upcast to bf16 in-kernel)
    xw_scaled: (R, Np, Fout) (X @ W_r) * out_deg^{-1/2}, compute_dtype, VMEM-resident
    in_scale:  (R, Np, 1)    in_deg^{-1/2} per destination, f32
    b_sum:     (1, Fout)     sum_r b_r, f32
    """
    R, Np, _ = adj_i8.shape
    Fout = xw_scaled.shape[2]
    n_tiles = Np // tm

    def kernel(a_ref, xw_ref, is_ref, b_ref, o_ref, acc_ref):
        r = pl.program_id(1)

        @pl.when(r == 0)
        def _():
            acc_ref[...] = jnp.zeros_like(acc_ref)

        # int8 -> bf16 upcast on the VPU; hidden under the A-tile DMA / MXU work.
        a = a_ref[0].astype(compute_dtype)                        # (tm, Np)
        contrib = jnp.dot(a, xw_ref[r], preferred_element_type=jnp.float32)
        acc_ref[...] += contrib * is_ref[0]                       # f32 accumulate, dst-side norm

        @pl.when(r == pl.num_programs(1) - 1)
        def _():
            res = acc_ref[...] + b_ref[...]                       # summed bias, added once
            if apply_relu:
                res = jnp.maximum(res, 0.0)
            o_ref[...] = res.astype(o_ref.dtype)                  # bf16 output store

    return pl.pallas_call(
        kernel,
        out_shape=jax.ShapeDtypeStruct((Np, Fout), compute_dtype),
        grid_spec=pltpu.PrefetchScalarGridSpec(
            num_scalar_prefetch=0,
            grid=(n_tiles, R),
            in_specs=[
                # Streamed adjacency dst tile (the only big HBM stream).
                pl.BlockSpec((1, tm, Np), lambda i, r: (r, i, 0),
                             pipeline_mode=pl.Buffered(a_bufs)),
                # Resident projected features for all relations: constant block
                # index -> single-buffered.
                pl.BlockSpec((R, Np, Fout), lambda i, r: (0, 0, 0),
                             pipeline_mode=pl.Buffered(1)),
                # Destination-side degree scale tile.
                pl.BlockSpec((1, tm, 1), lambda i, r: (r, i, 0)),
                # Summed bias: constant block index -> single-buffered.
                pl.BlockSpec((1, Fout), lambda i, r: (0, 0),
                             pipeline_mode=pl.Buffered(1)),
            ],
            out_specs=pl.BlockSpec((tm, Fout), lambda i, r: (i, 0)),
            scratch_shapes=[pltpu.VMEM((tm, Fout), jnp.float32)],   # f32 accumulator
        ),
        compiler_params=pltpu.CompilerParams(
            dimension_semantics=("parallel", "arbitrary"),
            vmem_limit_bytes=vmem_limit,
        ),
    )(adj_i8, xw_scaled, in_scale, b_sum)


def rgcn_forward(adj, x, params, *, compute_dtype=jnp.bfloat16):
    """Full RGCN forward: conv1 -> ReLU -> conv2 (matches the PyTorch/DGL module)."""
    R, N, _ = adj.shape
    in_feats = x.shape[1]
    hid_feats = params["w1"].shape[2]
    out_feats = params["w2"].shape[2]

    fin_p = _round_up(in_feats, 128)
    hid_p = _round_up(hid_feats, 128)
    out_p = _round_up(out_feats, 128)
    n_pad, tm, vmem_limit, a_bufs = _plan(N, R, max(hid_p, out_p))
    pad_n = n_pad - N

    adj_f = adj.astype(jnp.float32)
    # DGL GraphConv norm='both' degree scales (clamped >= 1), computed on the
    # UNPADDED adjacency, shared by both layers.
    out_deg = jnp.maximum(adj_f.sum(axis=1), 1.0)          # (R, N) source out-degree
    in_deg = jnp.maximum(adj_f.sum(axis=2), 1.0)           # (R, N) destination in-degree
    out_scale = jnp.pad((out_deg ** -0.5)[:, :, None], ((0, 0), (0, pad_n), (0, 0)))
    in_scale = jnp.pad((in_deg ** -0.5)[:, :, None], ((0, 0), (0, pad_n), (0, 0)))

    # Binary adjacency stored as int8 in HBM (exact; halves the dominant stream).
    adj_i8 = jnp.pad(adj_f, ((0, 0), (0, pad_n), (0, pad_n))).astype(jnp.int8)

    # Zero-padded features / weights: padded rows/cols contribute nothing and are
    # sliced off at the end (padded h rows are benign: their A columns and
    # out_scale entries are zero).
    x_p = jnp.pad(x, ((0, pad_n), (0, fin_p - in_feats))).astype(compute_dtype)
    w1 = jnp.pad(params["w1"],
                 ((0, 0), (0, fin_p - in_feats), (0, hid_p - hid_feats))).astype(compute_dtype)
    w2 = jnp.pad(params["w2"],
                 ((0, 0), (0, hid_p - hid_feats), (0, out_p - out_feats))).astype(compute_dtype)
    # HeteroGraphConv(aggregate='sum') adds every relation's bias: fold sum_r b_r.
    b1_sum = jnp.pad(params["b1"], ((0, 0), (0, 0), (0, hid_p - hid_feats))
                     ).sum(axis=0).astype(jnp.float32)
    b2_sum = jnp.pad(params["b2"], ((0, 0), (0, 0), (0, out_p - out_feats))
                     ).sum(axis=0).astype(jnp.float32)

    # Hoisted per-relation projection (was redundantly recomputed per dst tile
    # inside the kernel): tiny matmul, done once per layer by XLA.
    xw1 = (jnp.einsum("nf,rfo->rno", x_p, w1, preferred_element_type=jnp.float32)
           * out_scale).astype(compute_dtype)
    h = _rgcn_aggregate(adj_i8, xw1, in_scale, b1_sum, apply_relu=True, tm=tm,
                        vmem_limit=vmem_limit, a_bufs=a_bufs,
                        compute_dtype=compute_dtype)

    xw2 = (jnp.einsum("nf,rfo->rno", h, w2, preferred_element_type=jnp.float32)
           * out_scale).astype(compute_dtype)
    out = _rgcn_aggregate(adj_i8, xw2, in_scale, b2_sum, apply_relu=False, tm=tm,
                          vmem_limit=vmem_limit, a_bufs=a_bufs,
                          compute_dtype=compute_dtype)
    return out[:N, :out_feats]

    # TODO(synk): for graphs where even a (32, Np) int8 adjacency slab exceeds the
    # VMEM budget, additionally tile the source/K axis (grid (i, r, k)).


def _glorot(key, shape):
    fan_in, fan_out = shape[-2], shape[-1]
    limit = (6.0 / (fan_in + fan_out)) ** 0.5
    return jax.random.uniform(key, shape, jnp.float32, -limit, limit)


def init_params(key, in_feats, hid_feats, out_feats, num_rel):
    k1, k2, k3, k4 = jax.random.split(key, 4)
    return {
        "w1": _glorot(k1, (num_rel, in_feats, hid_feats)),
        "b1": 0.1 * jax.random.normal(k2, (num_rel, 1, hid_feats), jnp.float32),
        "w2": _glorot(k3, (num_rel, hid_feats, out_feats)),
        "b2": 0.1 * jax.random.normal(k4, (num_rel, 1, out_feats), jnp.float32),
    }


if __name__ == "__main__":
    key = jax.random.PRNGKey(0)
    N = 16          # nodes
    R = 3           # number of relations (rel_names)
    in_feats, hid_feats, out_feats = 8, 32, 16

    k_adj, k_x, k_p = jax.random.split(key, 3)
    # Dense binary adjacency per relation, A[r, dst, src].
    adj = jax.random.bernoulli(k_adj, 0.3, (R, N, N)).astype(jnp.float32)
    x = jax.random.normal(k_x, (N, in_feats), jnp.float32)
    params = init_params(k_p, in_feats, hid_feats, out_feats, R)

    out = jax.jit(rgcn_forward)(adj, x, params)
    jax.block_until_ready(out)
    out_f32 = out.astype(jnp.float32)

    # Pure-JAX f32 reference of the same math (GraphConv norm='both', sum aggregate).
    out_deg = jnp.maximum(adj.sum(axis=1), 1.0)
    in_deg = jnp.maximum(adj.sum(axis=2), 1.0)
    adj_n = adj * (in_deg[:, :, None] ** -0.5) * (out_deg[:, None, :] ** -0.5)
    h_ref = jnp.maximum(
        jnp.einsum("rds,sf,rfo->do", adj_n, x, params["w1"]) + params["b1"].sum(axis=0),
        0.0,
    )
    out_ref = (
        jnp.einsum("rds,sf,rfo->do", adj_n, h_ref, params["w2"])
        + params["b2"].sum(axis=0)
    )

    assert out.shape == (N, out_feats)
    # bf16 compute/output vs an all-f32 reference: loosened tolerance.
    assert jnp.allclose(out_f32, out_ref, atol=1e-1, rtol=5e-2), float(
        jnp.max(jnp.abs(out_f32 - out_ref))
    )

    print("KERNEL_OK")
</pallas_src>

<mosaic_0001>
module attributes {stable_mosaic.version = 11 : i64} {
  func.func @kernel(%arg0: i32, %arg1: i32, %arg2: memref<1x64x128xi8, #tpu.memory_space<vmem>>, %arg3: memref<3x128x128xbf16, #tpu.memory_space<vmem>>, %arg4: memref<1x64x1xf32, #tpu.memory_space<vmem>>, %arg5: memref<1x128xf32, #tpu.memory_space<vmem>>, %arg6: memref<64x128xbf16, #tpu.memory_space<vmem>>, %arg7: memref<64x128xf32, #tpu.memory_space<vmem>>) attributes {dimension_semantics = [#tpu.dimension_semantics<parallel>, #tpu.dimension_semantics<arbitrary>], iteration_bounds = array<i64: 2, 3>, scalar_prefetch = 0 : i64, scratch_operands = 1 : i64, tpu.core_type = #tpu.core_type<tc>, window_params = [{pipeline_mode = #tpu.pipeline_mode<double_buffered>, transform_indices = @transform_0, window_bounds = array<i64: 1, 64, 128>}, {pipeline_mode = #tpu.pipeline_mode<synchronous>, transform_indices = @transform_1, window_bounds = array<i64: 3, 128, 128>}, {transform_indices = @transform_2, window_bounds = array<i64: 1, 64, 1>}, {pipeline_mode = #tpu.pipeline_mode<synchronous>, transform_indices = @transform_3, window_bounds = array<i64: 1, 128>}, {transform_indices = @transform_4, window_bounds = array<i64: 64, 128>}]} {
    %c0_i32 = arith.constant 0 : i32
    %0 = arith.cmpi eq, %arg1, %c0_i32 : i32
    %1 = arith.extui %0 : i1 to i32
    %c0_i32_0 = arith.constant 0 : i32
    %2 = arith.cmpi ne, %1, %c0_i32_0 : i32
    scf.if %2 {
      %cst_13 = arith.constant 0.000000e+00 : f32
      %20 = vector.broadcast %cst_13 : f32 to vector<64x128xf32>
      %c0_14 = arith.constant 0 : index
      %c0_15 = arith.constant 0 : index
      %21 = vector.load %arg7[%c0_14, %c0_15] : memref<64x128xf32, #tpu.memory_space<vmem>>, vector<64x128xf32>
      tpu.vector_store %arg7[%c0_14, %c0_15], %20 {strides = array<i32>} : memref<64x128xf32, #tpu.memory_space<vmem>>, vector<64x128xf32>,
    } else {
    }
    %c0 = arith.constant 0 : index
    %c0_1 = arith.constant 0 : index
    %c0_2 = arith.constant 0 : index
    %3 = vector.load %arg2[%c0, %c0_1, %c0_2] : memref<1x64x128xi8, #tpu.memory_space<vmem>>, vector<1x64x128xi8>
    %4 = vector.shape_cast %3 : vector<1x64x128xi8> to vector<64x128xi8>
    %5 = arith.sitofp %4 : vector<64x128xi8> to vector<64x128xbf16>
    %6 = arith.index_cast %arg1 : i32 to index
    %c0_3 = arith.constant 0 : index
    %c0_4 = arith.constant 0 : index
    %7 = vector.load %arg3[%6, %c0_3, %c0_4] : memref<3x128x128xbf16, #tpu.memory_space<vmem>>, vector<1x128x128xbf16>
    %8 = vector.shape_cast %7 : vector<1x128x128xbf16> to vector<128x128xbf16>
    %cst = arith.constant dense<0.000000e+00> : vector<64x128xf32>
    %9 = tpu.matmul %5, %8, %cst {dimension_numbers = #tpu.dot_dimension_numbers<[1], [0], [0], [1], [0, 0, 1, 1], [], []>} : vector<64x128xbf16>, vector<128x128xbf16>, vector<64x128xf32> -> vector<64x128xf32>
    %c0_5 = arith.constant 0 : index
    %c0_6 = arith.constant 0 : index
    %10 = vector.load %arg7[%c0_5, %c0_6] : memref<64x128xf32, #tpu.memory_space<vmem>>, vector<64x128xf32>
    %c0_7 = arith.constant 0 : index
    %c0_8 = arith.constant 0 : index
    %c0_9 = arith.constant 0 : index
    %11 = vector.load %arg4[%c0_7, %c0_8, %c0_9] : memref<1x64x1xf32, #tpu.memory_space<vmem>>, vector<1x64x1xf32>
    %12 = vector.shape_cast %11 : vector<1x64x1xf32> to vector<64x1xf32>
    %13 = vector.broadcast %12 : vector<64x1xf32> to vector<64x128xf32>
    %14 = arith.mulf %9, %13 : vector<64x128xf32>
    %15 = arith.addf %10, %14 : vector<64x128xf32>
    %c0_10 = arith.constant 0 : index
    %c0_11 = arith.constant 0 : index
    %16 = vector.load %arg7[%c0_10, %c0_11] : memref<64x128xf32, #tpu.memory_space<vmem>>, vector<64x128xf32>
    tpu.vector_store %arg7[%c0_10, %c0_11], %15 {strides = array<i32>} : memref<64x128xf32, #tpu.memory_space<vmem>>, vector<64x128xf32>,
    %c2_i32 = arith.constant 2 : i32
    %17 = arith.cmpi eq, %arg1, %c2_i32 : i32
    %18 = arith.extui %17 : i1 to i32
    %c0_i32_12 = arith.constant 0 : i32
    %19 = arith.cmpi ne, %18, %c0_i32_12 : i32
    scf.if %19 {
      %c0_13 = arith.constant 0 : index
      %c0_14 = arith.constant 0 : index
      %20 = vector.load %arg7[%c0_13, %c0_14] : memref<64x128xf32, #tpu.memory_space<vmem>>, vector<64x128xf32>
      %c0_15 = arith.constant 0 : index
      %c0_16 = arith.constant 0 : index
      %21 = vector.load %arg5[%c0_15, %c0_16] : memref<1x128xf32, #tpu.memory_space<vmem>>, vector<1x128xf32>
      %22 = vector.broadcast %21 : vector<1x128xf32> to vector<64x128xf32>
      %23 = arith.addf %20, %22 : vector<64x128xf32>
      %cst_17 = arith.constant 0.000000e+00 : f32
      %24 = vector.broadcast %cst_17 : f32 to vector<64x128xf32>
      %25 = arith.maximumf %23, %24 : vector<64x128xf32>
      %26 = arith.truncf %25 : vector<64x128xf32> to vector<64x128xbf16>
      %c0_18 = arith.constant 0 : index
      %c0_19 = arith.constant 0 : index
      %27 = vector.load %arg6[%c0_18, %c0_19] : memref<64x128xbf16, #tpu.memory_space<vmem>>, vector<64x128xbf16>
      tpu.vector_store %arg6[%c0_18, %c0_19], %26 {strides = array<i32>} : memref<64x128xbf16, #tpu.memory_space<vmem>>, vector<64x128xbf16>,
    } else {
    }
    return
  }
  func.func @transform_0(%arg0: i32, %arg1: i32) -> (i32, i32, i32) {
    %c0_i32 = arith.constant 0 : i32
    %c0_i32_0 = arith.constant 0 : i32
    return %arg1, %arg0, %c0_i32 : i32, i32, i32
  }
  func.func @transform_1(%arg0: i32, %arg1: i32) -> (i32, i32, i32) {
    %c0_i32 = arith.constant 0 : i32
    %c0_i32_0 = arith.constant 0 : i32
    %c0_i32_1 = arith.constant 0 : i32
    %c0_i32_2 = arith.constant 0 : i32
    return %c0_i32, %c0_i32_0, %c0_i32_1 : i32, i32, i32
  }
  func.func @transform_2(%arg0: i32, %arg1: i32) -> (i32, i32, i32) {
    %c0_i32 = arith.constant 0 : i32
    %c0_i32_0 = arith.constant 0 : i32
    return %arg1, %arg0, %c0_i32 : i32, i32, i32
  }
  func.func @transform_3(%arg0: i32, %arg1: i32) -> (i32, i32) {
    %c0_i32 = arith.constant 0 : i32
    %c0_i32_0 = arith.constant 0 : i32
    %c0_i32_1 = arith.constant 0 : i32
    return %c0_i32, %c0_i32_0 : i32, i32
  }
  func.func @transform_4(%arg0: i32, %arg1: i32) -> (i32, i32) {
    %c0_i32 = arith.constant 0 : i32
    %c0_i32_0 = arith.constant 0 : i32
    return %arg0, %c0_i32 : i32, i32
  }
}

module attributes {stable_mosaic.version = 11 : i64} {
  func.func @kernel(%arg0: i32, %arg1: i32, %arg2: memref<1x64x128xi8, #tpu.memory_space<vmem>>, %arg3: memref<3x128x128xbf16, #tpu.memory_space<vmem>>, %arg4: memref<1x64x1xf32, #tpu.memory_space<vmem>>, %arg5: memref<1x128xf32, #tpu.memory_space<vmem>>, %arg6: memref<64x128xbf16, #tpu.memory_space<vmem>>, %arg7: memref<64x128xf32, #tpu.memory_space<vmem>>) attributes {dimension_semantics = [#tpu.dimension_semantics<parallel>, #tpu.dimension_semantics<arbitrary>], iteration_bounds = array<i64: 2, 3>, scalar_prefetch = 0 : i64, scratch_operands = 1 : i64, tpu.core_type = #tpu.core_type<tc>, window_params = [{pipeline_mode = #tpu.pipeline_mode<double_buffered>, transform_indices = @transform_0, window_bounds = array<i64: 1, 64, 128>}, {pipeline_mode = #tpu.pipeline_mode<synchronous>, transform_indices = @transform_1, window_bounds = array<i64: 3, 128, 128>}, {transform_indices = @transform_2, window_bounds = array<i64: 1, 64, 1>}, {pipeline_mode = #tpu.pipeline_mode<synchronous>, transform_indices = @transform_3, window_bounds = array<i64: 1, 128>}, {transform_indices = @transform_4, window_bounds = array<i64: 64, 128>}]} {
    %c0_i32 = arith.constant 0 : i32
    %0 = arith.cmpi eq, %arg1, %c0_i32 : i32
    %1 = arith.extui %0 : i1 to i32
    %c0_i32_0 = arith.constant 0 : i32
    %2 = arith.cmpi ne, %1, %c0_i32_0 : i32
    scf.if %2 {
      %cst_13 = arith.constant 0.000000e+00 : f32
      %20 = vector.broadcast %cst_13 : f32 to vector<64x128xf32>
      %c0_14 = arith.constant 0 : index
      %c0_15 = arith.constant 0 : index
      %21 = vector.load %arg7[%c0_14, %c0_15] : memref<64x128xf32, #tpu.memory_space<vmem>>, vector<64x128xf32>
      tpu.vector_store %arg7[%c0_14, %c0_15], %20 {strides = array<i32>} : memref<64x128xf32, #tpu.memory_space<vmem>>, vector<64x128xf32>,
    } else {
    }
    %c0 = arith.constant 0 : index
    %c0_1 = arith.constant 0 : index
    %c0_2 = arith.constant 0 : index
    %3 = vector.load %arg2[%c0, %c0_1, %c0_2] : memref<1x64x128xi8, #tpu.memory_space<vmem>>, vector<1x64x128xi8>
    %4 = vector.shape_cast %3 : vector<1x64x128xi8> to vector<64x128xi8>
    %5 = arith.sitofp %4 : vector<64x128xi8> to vector<64x128xbf16>
    %6 = arith.index_cast %arg1 : i32 to index
    %c0_3 = arith.constant 0 : index
    %c0_4 = arith.constant 0 : index
    %7 = vector.load %arg3[%6, %c0_3, %c0_4] : memref<3x128x128xbf16, #tpu.memory_space<vmem>>, vector<1x128x128xbf16>
    %8 = vector.shape_cast %7 : vector<1x128x128xbf16> to vector<128x128xbf16>
    %cst = arith.constant dense<0.000000e+00> : vector<64x128xf32>
    %9 = tpu.matmul %5, %8, %cst {dimension_numbers = #tpu.dot_dimension_numbers<[1], [0], [0], [1], [0, 0, 1, 1], [], []>} : vector<64x128xbf16>, vector<128x128xbf16>, vector<64x128xf32> -> vector<64x128xf32>
    %c0_5 = arith.constant 0 : index
    %c0_6 = arith.constant 0 : index
    %10 = vector.load %arg7[%c0_5, %c0_6] : memref<64x128xf32, #tpu.memory_space<vmem>>, vector<64x128xf32>
    %c0_7 = arith.constant 0 : index
    %c0_8 = arith.constant 0 : index
    %c0_9 = arith.constant 0 : index
    %11 = vector.load %arg4[%c0_7, %c0_8, %c0_9] : memref<1x64x1xf32, #tpu.memory_space<vmem>>, vector<1x64x1xf32>
    %12 = vector.shape_cast %11 : vector<1x64x1xf32> to vector<64x1xf32>
    %13 = vector.broadcast %12 : vector<64x1xf32> to vector<64x128xf32>
    %14 = arith.mulf %9, %13 : vector<64x128xf32>
    %15 = arith.addf %10, %14 : vector<64x128xf32>
    %c0_10 = arith.constant 0 : index
    %c0_11 = arith.constant 0 : index
    %16 = vector.load %arg7[%c0_10, %c0_11] : memref<64x128xf32, #tpu.memory_space<vmem>>, vector<64x128xf32>
    tpu.vector_store %arg7[%c0_10, %c0_11], %15 {strides = array<i32>} : memref<64x128xf32, #tpu.memory_space<vmem>>, vector<64x128xf32>,
    %c2_i32 = arith.constant 2 : i32
    %17 = arith.cmpi eq, %arg1, %c2_i32 : i32
    %18 = arith.extui %17 : i1 to i32
    %c0_i32_12 = arith.constant 0 : i32
    %19 = arith.cmpi ne, %18, %c0_i32_12 : i32
    scf.if %19 {
      %c0_13 = arith.constant 0 : index
      %c0_14 = arith.constant 0 : index
      %20 = vector.load %arg7[%c0_13, %c0_14] : memref<64x128xf32, #tpu.memory_space<vmem>>, vector<64x128xf32>
      %c0_15 = arith.constant 0 : index
      %c0_16 = arith.constant 0 : index
      %21 = vector.load %arg5[%c0_15, %c0_16] : memref<1x128xf32, #tpu.memory_space<vmem>>, vector<1x128xf32>
      %22 = vector.broadcast %21 : vector<1x128xf32> to vector<64x128xf32>
      %23 = arith.addf %20, %22 : vector<64x128xf32>
      %24 = arith.truncf %23 : vector<64x128xf32> to vector<64x128xbf16>
      %c0_17 = arith.constant 0 : index
      %c0_18 = arith.constant 0 : index
      %25 = vector.load %arg6[%c0_17, %c0_18] : memref<64x128xbf16, #tpu.memory_space<vmem>>, vector<64x128xbf16>
      tpu.vector_store %arg6[%c0_17, %c0_18], %24 {strides = array<i32>} : memref<64x128xbf16, #tpu.memory_space<vmem>>, vector<64x128xbf16>,
    } else {
    }
    return
  }
  func.func @transform_0(%arg0: i32, %arg1: i32) -> (i32, i32, i32) {
    %c0_i32 = arith.constant 0 : i32
    %c0_i32_0 = arith.constant 0 : i32
    return %arg1, %arg0, %c0_i32 : i32, i32, i32
  }
  func.func @transform_1(%arg0: i32, %arg1: i32) -> (i32, i32, i32) {
    %c0_i32 = arith.constant 0 : i32
    %c0_i32_0 = arith.constant 0 : i32
    %c0_i32_1 = arith.constant 0 : i32
    %c0_i32_2 = arith.constant 0 : i32
    return %c0_i32, %c0_i32_0, %c0_i32_1 : i32, i32, i32
  }
  func.func @transform_2(%arg0: i32, %arg1: i32) -> (i32, i32, i32) {
    %c0_i32 = arith.constant 0 : i32
    %c0_i32_0 = arith.constant 0 : i32
    return %arg1, %arg0, %c0_i32 : i32, i32, i32
  }
  func.func @transform_3(%arg0: i32, %arg1: i32) -> (i32, i32) {
    %c0_i32 = arith.constant 0 : i32
    %c0_i32_0 = arith.constant 0 : i32
    %c0_i32_1 = arith.constant 0 : i32
    return %c0_i32, %c0_i32_0 : i32, i32
  }
  func.func @transform_4(%arg0: i32, %arg1: i32) -> (i32, i32) {
    %c0_i32 = arith.constant 0 : i32
    %c0_i32_0 = arith.constant 0 : i32
    return %arg0, %c0_i32 : i32, i32
  }
}

</mosaic_0001>

<bundles_post_ra>
// kernel: rgcn_forward.2
= control target key start
LH: loop header
LB: loop body
LE: loop exit
PB: predicated region body
PF: predicated region fallthrough
CT: control target
= control target key end

     0   :  { %s902_s15 = smov 0   ;;  %s904_s16 = smov 0   ;;  %s1003_s0 = inlined_call_operand.vmem [shape: s8[3,128,128], index: 0, kind: input, shape index: {}]   ;;  %s1004_s1 = inlined_call_operand.vmem [shape: bf16[3,128,128], index: 1, kind: input, shape index: {}]   ;;  %s1005_s2 = inlined_call_operand.vmem [shape: f32[3,128,1], index: 2, kind: input, shape index: {}]   ;;  %s1006_s3 = inlined_call_operand.vmem [shape: f32[1,128], index: 3, kind: input, shape index: {}]   ;;  %s1007_s4 = inlined_call_operand.vmem [shape: bf16[128,128], index: 4, kind: output, shape index: {}]  }
   0x1   :  { %s906_s17 = smov 0   ;;  %s908_s18 = smov 0  }
   0x2   :  { %s910_s19 = smov 0  }
   0x3 LB: > { %s23_s20 = sadd.s32 1, %s865_s17  ;;  %s26_s21 = sadd.s32 1, %s869_s18  ;;  %s873_s19 = sphi %s910_s19, %s14_s19   ;;  %s869_s18 = sphi %s908_s18, %s1011_s18   ;;  %s865_s17 = sphi %s906_s17, %s1010_s17   ;;  %s861_s16 = sphi %s904_s16, %s1009_s16   ;;  %s857_s15 = sphi %s902_s15, %s1008_s15  }
   0x4   : > { %p24_p0 = scmp.ge.s32.totalorder %s23_s20, 3  ;;  %p667_p1 = scmp.ge.s32.totalorder %s873_s19, 1 }
   0x5   : > { %p198_p2 = scmp.lt.s32.totalorder %s873_s19, 7 }
   0x6   : > { %s1013_s20 = smov (%p24_p0, %s23_s20), 0  ;;  %s1015_s21 = smov (!%p24_p0, %s26_s21), %s869_s18 }
   0x7   : > { %p199_p3 = pnand %p667_p1, %p198_p2  ;;  %p28_p4 = scmp.ge.s32.totalorder %s1015_s21, 2 }
   0x8   : > { %s668_s22 = sshll.u32 (!%p199_p3), %s861_s16, 1  ;;  %p238_p5 = scmp.lt.s32.totalorder (!%p199_p3), %s857_s15, 2 }
   0x9   : > { %s1017_s21 = smov (%p28_p4, %s1015_s21), 0  ;;  %202 = sbr.rel (%p199_p3) target bundleno = 286 (0x11e), region = 36 }
   0xa   : > { %p240_p6 = scmp.lt.s32.totalorder (!%p199_p3), %s668_s22, 3  ;;  %s671_s23 = sshll.u32 (!%p199_p3), %s861_s16, 3 }
   0xb   : > { %p250_p7 = scmp.lt.s32.totalorder (!%p199_p3), %s671_s23, 15  ;;  %p676_p8 = scmp.ne.s32.totalorder (!%p199_p3), %s857_s15, 0 }
   0xe   : > { %s239_s24 = scalar_select %p238_p5, %s857_s15, 2 }
   0xf   : > { %s1019_s22 = smov (!%p240_p6, %s668_s22), 3  ;;  %s1021_s23 = smov (!%p250_p7, %s671_s23), 15 }
  0x10   : > { %s669_s25 = sshll.u32 %s239_s24, 2  ;;  %s672_s5 = sshll.u32 %s239_s24, 4 }
  0x11   : > { %s243_s26 = sadd.s32 %s669_s25, %s1019_s22  ;;  %s253_s6 = sadd.s32 %s672_s5, %s1021_s23 }
  0x12   : > { %s670_s27 = sshll.u32 %s243_s26, 3  ;;  %s675_s7 = sshll.u32 %s1021_s23, 2 }
  0x13   : > { %s245_s30 = scalar_lea.vmem %s1003_s0, %s670_s27  ;;  %s673_s8 = sshll.u32 %s253_s6, 3 }
  0x14   : > { %s942_s11 = scalar_lea.vmem %s1007_s4, %s675_s7  ;;  %s947_s14 = scalar_lea.vmem %s1005_s2, %s673_s8 }
  0x15   : > { %267 = sbr.rel (%p676_p8) target bundleno = 31 (0x1f), region = 40 }
  0x1a   : > { %v875_v0 = vmov 0.0  }
  0x1b   : > { %268 = vst [vmem:[#allocation2 + $0x30] sm:$0xff] %v875_v0  ;;  %269 = vst [vmem:[#allocation2] sm:$0xff] %v875_v0 }
  0x1c   : > { %270 = vst [vmem:[#allocation2 + $0x18] sm:$0xff] %v875_v0  ;;  %271 = vst [vmem:[#allocation2 + $0x10] sm:$0xff] %v875_v0 }
  0x1d   : > { %272 = vst [vmem:[#allocation2 + $0x8] sm:$0xff] %v875_v0  ;;  %273 = vst [vmem:[#allocation2 + $0x20] sm:$0xff] %v875_v0 }
  0x1e   : > { %274 = vst [vmem:[#allocation2 + $0x28] sm:$0xff] %v875_v0  ;;  %275 = vst [vmem:[#allocation2 + $0x38] sm:$0xff] %v875_v0 }
  0x1f PF: > { %s699_s16 = sshll.u32 %s857_s15, 6  ;;  %v951_v1 = vld [vmem:[%s245_s30] sm:$0xff]  ;;  %v953_v2 = vld [vmem:[%s245_s30 + $0x8] sm:$0xff]  ;;  %v424_v3 = vld [vmem:[%s947_s14 + $0x10] sm:$0xff]  ;;  %v876_v6 = vmov 0   ;;  %p687_p9 = scmp.ne.s32.totalorder %s857_s15, 2 }
  0x20   : > { %s959_s24 = scalar_lea.vmem %s1004_s1, %s699_s16  ;;  %v278_v4 = vunpack.c.l.s8.bf16 %v951_v1  ;;  %v280_v5 = vunpack.c.l.s8.bf16 %v953_v2  ;;  %826 = vset.pattern.permute.xlu1 %v876_v6  ;;  %825 = vset.pattern.permute.xlu0 %v876_v6  ;;  %v422_v7 = vld [vmem:[%s947_s14] sm:$0xff]  ;;  %v425_v9 = vld [vmem:[%s947_s14 + $0x18] sm:$0xff]  ;;  %v423_v11 = vld [vmem:[%s947_s14 + $0x8] sm:$0xff]  ;;  %v279_v22 = vunpack.c.h.s8.bf16 %v951_v1  ;;  %v281_v23 = vunpack.c.h.s8.bf16 %v953_v2 }
  0x21   : > { %v827_v8 = vld [vmem:[%s959_s24 + $0x38] sm:$0xff]   ;;  %442 = vperm.xlu1 %826, %v424_v3   ;;  %432 = vperm.xlu0 %825, %v422_v7   ;;  %v828_v10 = vld [vmem:[%s959_s24 + $0x30] sm:$0xff]   ;;  %v829_v12 = vld [vmem:[%s959_s24 + $0x28] sm:$0xff]  }
  0x22   : > { %759 = vmatprep.mubr.bf16.mxu0 %v278_v4  ;;  %763 = vmatprep.mubr.bf16.mxu1 %v280_v5  ;;  %v830_v13 = vld [vmem:[%s959_s24 + $0x20] sm:$0xff]   ;;  %v427_v14 = vld [vmem:[%s947_s14 + $0x28] sm:$0xff]  ;;  %v429_v16 = vld [vmem:[%s947_s14 + $0x38] sm:$0xff] }
  0x23   : > { %743 = vmatprep.subr.bf16.mxu0 %v827_v8  ;;  %767 = vmatprep.subr.bf16.mxu1 %v827_v8  ;;  %v426_v15 = vld [vmem:[%s947_s14 + $0x20] sm:$0xff]  ;;  %v428_v17 = vld [vmem:[%s947_s14 + $0x30] sm:$0xff]  ;;  %v831_v18 = vld [vmem:[%s959_s24 + $0x18] sm:$0xff]  }
  0x24   : > { %744 = vmatpush3.bf16.msra.mxu0 %v827_v8  ;;  %775 = vmatpush3.bf16.msra.mxu1 %v827_v8  ;;  %v832_v19 = vld [vmem:[%s959_s24 + $0x10] sm:$0xff]   ;;  %v833_v20 = vld [vmem:[%s959_s24 + $0x8] sm:$0xff]   ;;  %v834_v21 = vld [vmem:[%s959_s24] sm:$0xff]  }
  0x25   : > { %745 = vmatprep.subr.bf16.mxu0 %v828_v10  ;;  %768 = vmatprep.subr.bf16.mxu1 %v828_v10  ;;  %v416_v32 = vld [vmem:[#allocation2 + $0x18] sm:$0xff]  ;;  %v420_v34 = vld [vmem:[#allocation2 + $0x28] sm:$0xff]  ;;  %v414_v38 = vld [vmem:[#allocation2 + $0x30] sm:$0xff] }
  0x26   : > { %447 = vperm.xlu1 %826, %v425_v9   ;;  %437 = vperm.xlu0 %825, %v423_v11   ;;  %v418_v40 = vld [vmem:[#allocation2 + $0x8] sm:$0xff]  ;;  %v417_v47 = vld [vmem:[#allocation2 + $0x10] sm:$0xff]  ;;  %v421_v49 = vld [vmem:[#allocation2 + $0x38] sm:$0xff] }
  0x27   : > { %v415_v55 = vld [vmem:[#allocation2] sm:$0xff] }
  0x28   : > { %746 = vmatpush3.bf16.msra.mxu0 %v828_v10  ;;  %776 = vmatpush3.bf16.msra.mxu1 %v828_v10  ;;  %v419_v57 = vld [vmem:[#allocation2 + $0x20] sm:$0xff] }
  0x29   : > { %747 = vmatprep.subr.bf16.mxu0 %v829_v12  ;;  %769 = vmatprep.subr.bf16.mxu1 %v829_v12 }
  0x2a   : > { %457 = vperm.xlu1 %826, %v427_v14   ;;  %452 = vperm.xlu0 %825, %v426_v15  }
  0x2c   : > { %748 = vmatpush3.bf16.msra.mxu0 %v829_v12  ;;  %777 = vmatpush3.bf16.msra.mxu1 %v829_v12 }
  0x2d   : > { %749 = vmatprep.subr.bf16.mxu0 %v830_v13  ;;  %770 = vmatprep.subr.bf16.mxu1 %v830_v13 }
  0x2e   : > { %467 = vperm.xlu1 %826, %v429_v16   ;;  %462 = vperm.xlu0 %825, %v428_v17  }
  0x30   : > { %750 = vmatpush3.bf16.msra.mxu0 %v830_v13  ;;  %778 = vmatpush3.bf16.msra.mxu1 %v830_v13 }
  0x31   : > { %751 = vmatprep.subr.bf16.mxu0 %v831_v18  ;;  %771 = vmatprep.subr.bf16.mxu1 %v831_v18 }
  0x34   : > { %752 = vmatpush3.bf16.msra.mxu0 %v831_v18  ;;  %779 = vmatpush3.bf16.msra.mxu1 %v831_v18 }
  0x35   : > { %753 = vmatprep.subr.bf16.mxu0 %v832_v19  ;;  %772 = vmatprep.subr.bf16.mxu1 %v832_v19 }
  0x38   : > { %754 = vmatpush3.bf16.msra.mxu0 %v832_v19  ;;  %780 = vmatpush3.bf16.msra.mxu1 %v832_v19 }
  0x39   : > { %755 = vmatprep.subr.bf16.mxu0 %v833_v20  ;;  %773 = vmatprep.subr.bf16.mxu1 %v833_v20 }
  0x3c   : > { %756 = vmatpush3.bf16.msra.mxu0 %v833_v20  ;;  %781 = vmatpush3.bf16.msra.mxu1 %v833_v20 }
  0x3d   : > { %757 = vmatprep.subr.bf16.mxu0 %v834_v21  ;;  %774 = vmatprep.subr.bf16.mxu1 %v834_v21 }
  0x40   : > { %758 = vmatpush3.bf16.msra.mxu0 %v834_v21  ;;  %782 = vmatpush3.bf16.msra.mxu1 %v834_v21 }
  0x43   : > { %760 = vmatmul.mubr.bf16.vlgmr.msra.gmra.mxu0 %v279_v22  ;;  %764 = vmatmul.mubr.bf16.vlgmr.msra.gmra.mxu1 %v281_v23 }
  0x9c   : > { %v433_v24 = vpop.permute.xlu0 %432  ;;  %v443_v25 = vpop.permute.xlu1 %442 }
  0xa1   : > { %v438_v26 = vpop.permute.xlu0 %437  ;;  %v448_v27 = vpop.permute.xlu1 %447 }
  0xa5   : > { %v453_v28 = vpop.permute.xlu0 %452  ;;  %v458_v29 = vpop.permute.xlu1 %457 }
  0xa9   : > { %v463_v30 = vpop.permute.xlu0 %462  ;;  %v468_v41 = vpop.permute.xlu1 %467 }
 0x103   : > { %v761_v31 = vpop.f32.mrf.mxu0  ;;  %v765_v33 = vpop.f32.mrf.mxu1 }
 0x104   : > { %v472_v35 = vmul.f32 %v761_v31, %v443_v25  ;;  %v476_v36 = vmul.f32 %v765_v33, %v463_v30 }
 0x105   : > { %v383_v37 = vpop.f32.mrf.mxu0  ;;  %v399_v39 = vpop.f32.mrf.mxu1 }
 0x106   : > { %v480_v42 = vadd.f32 %v472_v35, %v416_v32  ;;  %v484_v43 = vadd.f32 %v476_v36, %v420_v34  ;;  %v470_v44 = vmul.f32 %v433_v24, %v383_v37  ;;  %v474_v45 = vmul.f32 %v453_v28, %v399_v39 }
 0x107   : > { %v762_v46 = vpop.f32.mrf.mxu0  ;;  %v766_v48 = vpop.f32.mrf.mxu1 }
 0x108   : > { %488 = vst [vmem:[#allocation2 + $0x18] sm:$0xff] %v480_v42  ;;  %492 = vst [vmem:[#allocation2 + $0x28] sm:$0xff] %v484_v43  ;;  %v478_v50 = vadd.f32 %v470_v44, %v414_v38  ;;  %v482_v51 = vadd.f32 %v474_v45, %v418_v40  ;;  %v473_v52 = vmul.f32 %v762_v46, %v448_v27 }
 0x109   : > { %v477_v53 = vmul.f32 %v766_v48, %v468_v41  ;;  %v386_v54 = vpop.f32.mrf.mxu0  ;;  %v402_v56 = vpop.f32.mrf.mxu1 }
 0x10a   : > { %486 = vst [vmem:[#allocation2 + $0x30] sm:$0xff] %v478_v50  ;;  %490 = vst [vmem:[#allocation2 + $0x8] sm:$0xff] %v482_v51  ;;  %v481_v58 = vadd.f32 %v473_v52, %v417_v47  ;;  %v471_v60 = vmul.f32 %v438_v26, %v386_v54  ;;  %v475_v61 = vmul.f32 %v458_v29, %v402_v56  ;;  %497 = sbr.rel (%p687_p9) target bundleno = 286 (0x11e), region = 44 }
 0x10b   : > { %v485_v59 = vadd.f32 %v477_v53, %v421_v49 }
 0x10c   : > { %489 = vst [vmem:[#allocation2 + $0x10] sm:$0xff] %v481_v58  ;;  %v479_v62 = vadd.f32 %v471_v60, %v415_v55  ;;  %v483_v63 = vadd.f32 %v475_v61, %v419_v57 }
 0x10d   : > { %493 = vst [vmem:[#allocation2 + $0x38] sm:$0xff] %v485_v59 }
 0x10e   : > { %487 = vst [vmem:[#allocation2] sm:$0xff] %v479_v62  ;;  %491 = vst [vmem:[#allocation2 + $0x20] sm:$0xff] %v483_v63 }
 0x10f   : > { %v688_v2 = vld [vmem:[%s1006_s3] ss:$0 sm:$0xff]  ;;  %v500_v5 = vld [vmem:[#allocation2 + $0x18] sm:$0xff]  ;;  %v504_v12 = vld [vmem:[#allocation2 + $0x28] sm:$0xff] }
 0x110   : > { %v515_v8 = vadd.f32 %v688_v2, %v500_v5  ;;  %v519_v17 = vadd.f32 %v688_v2, %v504_v12 }
 0x111   : > { %v498_v0 = vld [vmem:[#allocation2 + $0x30] sm:$0xff]  ;;  %v502_v7 = vld [vmem:[#allocation2 + $0x8] sm:$0xff] }
 0x112   : > { %v513_v3 = vadd.f32 %v688_v2, %v498_v0  ;;  %v517_v11 = vadd.f32 %v688_v2, %v502_v7  ;;  %v523_v18 = vmax.f32 %v515_v8, 0.0  ;;  %v527_v24 = vmax.f32 %v519_v17, 0.0 }
 0x113   : > { %v501_v6 = vld [vmem:[#allocation2 + $0x10] sm:$0xff] }
 0x114   : > { %v516_v9 = vadd.f32 %v688_v2, %v501_v6  ;;  %v505_v13 = vld [vmem:[#allocation2 + $0x38] sm:$0xff]  ;;  %v521_v14 = vmax.f32 %v513_v3, 0.0  ;;  %v525_v20 = vmax.f32 %v517_v11, 0.0 }
 0x115   : > { %v499_v1 = vld [vmem:[#allocation2] sm:$0xff]  ;;  %v520_v21 = vadd.f32 %v688_v2, %v505_v13 }
 0x116   : > { %v514_v4 = vadd.f32 %v688_v2, %v499_v1  ;;  %v503_v10 = vld [vmem:[#allocation2 + $0x20] sm:$0xff]  ;;  %v524_v19 = vmax.f32 %v516_v9, 0.0 }
 0x117   : > { %v518_v16 = vadd.f32 %v688_v2, %v503_v10  ;;  %v528_v26 = vmax.f32 %v520_v21, 0.0 }
 0x118   : > { %v522_v15 = vmax.f32 %v514_v4, 0.0  ;;  %v716_v25 = vpack.c.bf16 %v524_v19, %v523_v18 }
 0x119   : > { %v526_v23 = vmax.f32 %v518_v16, 0.0  ;;  %v726_v28 = vpack.c.bf16 %v528_v26, %v527_v24 }
 0x11a   : > { %v711_v22 = vpack.c.bf16 %v522_v15, %v521_v14  ;;  %728 = vst [vmem:[%s942_s11 + $0x8] sm:$0xff] %v716_v25  }
 0x11b   : > { %v721_v27 = vpack.c.bf16 %v526_v23, %v525_v20  ;;  %730 = vst [vmem:[%s942_s11 + $0x18] sm:$0xff] %v726_v28  }
 0x11c   : > { %712 = vst [vmem:[%s942_s11] sm:$0xff] %v711_v22  }
 0x11d   : > { %729 = vst [vmem:[%s942_s11 + $0x10] sm:$0xff] %v721_v27  }
 0x11e PF: > { %s14_s19 = sadd.s32 1, %s873_s19   ;;  %s1008_s15 = smov %s865_s17 }
 0x11f   : > { %p11_p10 = scmp.ge.s32.totalorder %s14_s19, 8   ;;  %s1009_s16 = smov %s869_s18 }
 0x120   : > { %s1010_s17 = smov %s1013_s20  ;;  %s1011_s18 = smov %s1017_s21 }
 0x121   :  { %13 = sbr.rel (!%p11_p10) target bundleno = 3 (0x3), region = 78 }

// kernel: rgcn_forward.3
= control target key start
LH: loop header
LB: loop body
LE: loop exit
PB: predicated region body
PF: predicated region fallthrough
CT: control target
= control target key end

     0   :  { %s894_s15 = smov 0   ;;  %s896_s16 = smov 0   ;;  %s995_s0 = inlined_call_operand.vmem [shape: s8[3,128,128], index: 0, kind: input, shape index: {}]   ;;  %s996_s1 = inlined_call_operand.vmem [shape: bf16[3,128,128], index: 1, kind: input, shape index: {}]   ;;  %s997_s2 = inlined_call_operand.vmem [shape: f32[3,128,1], index: 2, kind: input, shape index: {}]   ;;  %s998_s3 = inlined_call_operand.vmem [shape: f32[1,128], index: 3, kind: input, shape index: {}]   ;;  %s999_s4 = inlined_call_operand.vmem [shape: bf16[128,128], index: 4, kind: output, shape index: {}]  }
   0x1   :  { %s898_s17 = smov 0   ;;  %s900_s18 = smov 0  }
   0x2   :  { %s902_s19 = smov 0  }
   0x3 LB: > { %s23_s20 = sadd.s32 1, %s857_s17  ;;  %s26_s21 = sadd.s32 1, %s861_s18  ;;  %s865_s19 = sphi %s902_s19, %s14_s19   ;;  %s861_s18 = sphi %s900_s18, %s1003_s18   ;;  %s857_s17 = sphi %s898_s17, %s1002_s17   ;;  %s853_s16 = sphi %s896_s16, %s1001_s16   ;;  %s849_s15 = sphi %s894_s15, %s1000_s15  }
   0x4   : > { %p24_p0 = scmp.ge.s32.totalorder %s23_s20, 3  ;;  %p659_p1 = scmp.ge.s32.totalorder %s865_s19, 1 }
   0x5   : > { %p198_p2 = scmp.lt.s32.totalorder %s865_s19, 7 }
   0x6   : > { %s1005_s20 = smov (%p24_p0, %s23_s20), 0  ;;  %s1007_s21 = smov (!%p24_p0, %s26_s21), %s861_s18 }
   0x7   : > { %p199_p3 = pnand %p659_p1, %p198_p2  ;;  %p28_p4 = scmp.ge.s32.totalorder %s1007_s21, 2 }
   0x8   : > { %s660_s22 = sshll.u32 (!%p199_p3), %s853_s16, 1  ;;  %p238_p5 = scmp.lt.s32.totalorder (!%p199_p3), %s849_s15, 2 }
   0x9   : > { %s1009_s21 = smov (%p28_p4, %s1007_s21), 0  ;;  %202 = sbr.rel (%p199_p3) target bundleno = 284 (0x11c), region = 36 }
   0xa   : > { %p240_p6 = scmp.lt.s32.totalorder (!%p199_p3), %s660_s22, 3  ;;  %s663_s23 = sshll.u32 (!%p199_p3), %s853_s16, 3 }
   0xb   : > { %p250_p7 = scmp.lt.s32.totalorder (!%p199_p3), %s663_s23, 15  ;;  %p668_p8 = scmp.ne.s32.totalorder (!%p199_p3), %s849_s15, 0 }
   0xe   : > { %s239_s24 = scalar_select %p238_p5, %s849_s15, 2 }
   0xf   : > { %s1011_s22 = smov (!%p240_p6, %s660_s22), 3  ;;  %s1013_s23 = smov (!%p250_p7, %s663_s23), 15 }
  0x10   : > { %s661_s25 = sshll.u32 %s239_s24, 2  ;;  %s664_s5 = sshll.u32 %s239_s24, 4 }
  0x11   : > { %s243_s26 = sadd.s32 %s661_s25, %s1011_s22  ;;  %s253_s6 = sadd.s32 %s664_s5, %s1013_s23 }
  0x12   : > { %s662_s27 = sshll.u32 %s243_s26, 3  ;;  %s667_s7 = sshll.u32 %s1013_s23, 2 }
  0x13   : > { %s245_s30 = scalar_lea.vmem %s995_s0, %s662_s27  ;;  %s665_s8 = sshll.u32 %s253_s6, 3 }
  0x14   : > { %s934_s11 = scalar_lea.vmem %s999_s4, %s667_s7  ;;  %s939_s14 = scalar_lea.vmem %s997_s2, %s665_s8 }
  0x15   : > { %267 = sbr.rel (%p668_p8) target bundleno = 31 (0x1f), region = 40 }
  0x1a   : > { %v867_v0 = vmov 0.0  }
  0x1b   : > { %268 = vst [vmem:[#allocation2 + $0x30] sm:$0xff] %v867_v0  ;;  %269 = vst [vmem:[#allocation2] sm:$0xff] %v867_v0 }
  0x1c   : > { %270 = vst [vmem:[#allocation2 + $0x18] sm:$0xff] %v867_v0  ;;  %271 = vst [vmem:[#allocation2 + $0x10] sm:$0xff] %v867_v0 }
  0x1d   : > { %272 = vst [vmem:[#allocation2 + $0x8] sm:$0xff] %v867_v0  ;;  %273 = vst [vmem:[#allocation2 + $0x20] sm:$0xff] %v867_v0 }
  0x1e   : > { %274 = vst [vmem:[#allocation2 + $0x28] sm:$0xff] %v867_v0  ;;  %275 = vst [vmem:[#allocation2 + $0x38] sm:$0xff] %v867_v0 }
  0x1f PF: > { %s691_s16 = sshll.u32 %s849_s15, 6  ;;  %v943_v1 = vld [vmem:[%s245_s30] sm:$0xff]  ;;  %v945_v2 = vld [vmem:[%s245_s30 + $0x8] sm:$0xff]  ;;  %v424_v3 = vld [vmem:[%s939_s14 + $0x10] sm:$0xff]  ;;  %v868_v6 = vmov 0   ;;  %p679_p9 = scmp.ne.s32.totalorder %s849_s15, 2 }
  0x20   : > { %s951_s24 = scalar_lea.vmem %s996_s1, %s691_s16  ;;  %v278_v4 = vunpack.c.l.s8.bf16 %v943_v1  ;;  %v280_v5 = vunpack.c.l.s8.bf16 %v945_v2  ;;  %818 = vset.pattern.permute.xlu1 %v868_v6  ;;  %817 = vset.pattern.permute.xlu0 %v868_v6  ;;  %v422_v7 = vld [vmem:[%s939_s14] sm:$0xff]  ;;  %v425_v9 = vld [vmem:[%s939_s14 + $0x18] sm:$0xff]  ;;  %v423_v11 = vld [vmem:[%s939_s14 + $0x8] sm:$0xff]  ;;  %v279_v22 = vunpack.c.h.s8.bf16 %v943_v1  ;;  %v281_v23 = vunpack.c.h.s8.bf16 %v945_v2 }
  0x21   : > { %v819_v8 = vld [vmem:[%s951_s24 + $0x38] sm:$0xff]   ;;  %442 = vperm.xlu1 %818, %v424_v3   ;;  %432 = vperm.xlu0 %817, %v422_v7   ;;  %v820_v10 = vld [vmem:[%s951_s24 + $0x30] sm:$0xff]   ;;  %v821_v12 = vld [vmem:[%s951_s24 + $0x28] sm:$0xff]  }
  0x22   : > { %751 = vmatprep.mubr.bf16.mxu0 %v278_v4  ;;  %755 = vmatprep.mubr.bf16.mxu1 %v280_v5  ;;  %v822_v13 = vld [vmem:[%s951_s24 + $0x20] sm:$0xff]   ;;  %v427_v14 = vld [vmem:[%s939_s14 + $0x28] sm:$0xff]  ;;  %v429_v16 = vld [vmem:[%s939_s14 + $0x38] sm:$0xff] }
  0x23   : > { %735 = vmatprep.subr.bf16.mxu0 %v819_v8  ;;  %759 = vmatprep.subr.bf16.mxu1 %v819_v8  ;;  %v426_v15 = vld [vmem:[%s939_s14 + $0x20] sm:$0xff]  ;;  %v428_v17 = vld [vmem:[%s939_s14 + $0x30] sm:$0xff]  ;;  %v823_v18 = vld [vmem:[%s951_s24 + $0x18] sm:$0xff]  }
  0x24   : > { %736 = vmatpush3.bf16.msra.mxu0 %v819_v8  ;;  %767 = vmatpush3.bf16.msra.mxu1 %v819_v8  ;;  %v824_v19 = vld [vmem:[%s951_s24 + $0x10] sm:$0xff]   ;;  %v825_v20 = vld [vmem:[%s951_s24 + $0x8] sm:$0xff]   ;;  %v826_v21 = vld [vmem:[%s951_s24] sm:$0xff]  }
  0x25   : > { %737 = vmatprep.subr.bf16.mxu0 %v820_v10  ;;  %760 = vmatprep.subr.bf16.mxu1 %v820_v10  ;;  %v416_v32 = vld [vmem:[#allocation2 + $0x18] sm:$0xff]  ;;  %v420_v34 = vld [vmem:[#allocation2 + $0x28] sm:$0xff]  ;;  %v414_v38 = vld [vmem:[#allocation2 + $0x30] sm:$0xff] }
  0x26   : > { %447 = vperm.xlu1 %818, %v425_v9   ;;  %437 = vperm.xlu0 %817, %v423_v11   ;;  %v418_v40 = vld [vmem:[#allocation2 + $0x8] sm:$0xff]  ;;  %v417_v47 = vld [vmem:[#allocation2 + $0x10] sm:$0xff]  ;;  %v421_v49 = vld [vmem:[#allocation2 + $0x38] sm:$0xff] }
  0x27   : > { %v415_v55 = vld [vmem:[#allocation2] sm:$0xff] }
  0x28   : > { %738 = vmatpush3.bf16.msra.mxu0 %v820_v10  ;;  %768 = vmatpush3.bf16.msra.mxu1 %v820_v10  ;;  %v419_v57 = vld [vmem:[#allocation2 + $0x20] sm:$0xff] }
  0x29   : > { %739 = vmatprep.subr.bf16.mxu0 %v821_v12  ;;  %761 = vmatprep.subr.bf16.mxu1 %v821_v12 }
  0x2a   : > { %457 = vperm.xlu1 %818, %v427_v14   ;;  %452 = vperm.xlu0 %817, %v426_v15  }
  0x2c   : > { %740 = vmatpush3.bf16.msra.mxu0 %v821_v12  ;;  %769 = vmatpush3.bf16.msra.mxu1 %v821_v12 }
  0x2d   : > { %741 = vmatprep.subr.bf16.mxu0 %v822_v13  ;;  %762 = vmatprep.subr.bf16.mxu1 %v822_v13 }
  0x2e   : > { %467 = vperm.xlu1 %818, %v429_v16   ;;  %462 = vperm.xlu0 %817, %v428_v17  }
  0x30   : > { %742 = vmatpush3.bf16.msra.mxu0 %v822_v13  ;;  %770 = vmatpush3.bf16.msra.mxu1 %v822_v13 }
  0x31   : > { %743 = vmatprep.subr.bf16.mxu0 %v823_v18  ;;  %763 = vmatprep.subr.bf16.mxu1 %v823_v18 }
  0x34   : > { %744 = vmatpush3.bf16.msra.mxu0 %v823_v18  ;;  %771 = vmatpush3.bf16.msra.mxu1 %v823_v18 }
  0x35   : > { %745 = vmatprep.subr.bf16.mxu0 %v824_v19  ;;  %764 = vmatprep.subr.bf16.mxu1 %v824_v19 }
  0x38   : > { %746 = vmatpush3.bf16.msra.mxu0 %v824_v19  ;;  %772 = vmatpush3.bf16.msra.mxu1 %v824_v19 }
  0x39   : > { %747 = vmatprep.subr.bf16.mxu0 %v825_v20  ;;  %765 = vmatprep.subr.bf16.mxu1 %v825_v20 }
  0x3c   : > { %748 = vmatpush3.bf16.msra.mxu0 %v825_v20  ;;  %773 = vmatpush3.bf16.msra.mxu1 %v825_v20 }
  0x3d   : > { %749 = vmatprep.subr.bf16.mxu0 %v826_v21  ;;  %766 = vmatprep.subr.bf16.mxu1 %v826_v21 }
  0x40   : > { %750 = vmatpush3.bf16.msra.mxu0 %v826_v21  ;;  %774 = vmatpush3.bf16.msra.mxu1 %v826_v21 }
  0x43   : > { %752 = vmatmul.mubr.bf16.vlgmr.msra.gmra.mxu0 %v279_v22  ;;  %756 = vmatmul.mubr.bf16.vlgmr.msra.gmra.mxu1 %v281_v23 }
  0x9c   : > { %v433_v24 = vpop.permute.xlu0 %432  ;;  %v443_v25 = vpop.permute.xlu1 %442 }
  0xa1   : > { %v438_v26 = vpop.permute.xlu0 %437  ;;  %v448_v27 = vpop.permute.xlu1 %447 }
  0xa5   : > { %v453_v28 = vpop.permute.xlu0 %452  ;;  %v458_v29 = vpop.permute.xlu1 %457 }
  0xa9   : > { %v463_v30 = vpop.permute.xlu0 %462  ;;  %v468_v41 = vpop.permute.xlu1 %467 }
 0x103   : > { %v753_v31 = vpop.f32.mrf.mxu0  ;;  %v757_v33 = vpop.f32.mrf.mxu1 }
 0x104   : > { %v472_v35 = vmul.f32 %v753_v31, %v443_v25  ;;  %v476_v36 = vmul.f32 %v757_v33, %v463_v30 }
 0x105   : > { %v383_v37 = vpop.f32.mrf.mxu0  ;;  %v399_v39 = vpop.f32.mrf.mxu1 }
 0x106   : > { %v480_v42 = vadd.f32 %v472_v35, %v416_v32  ;;  %v484_v43 = vadd.f32 %v476_v36, %v420_v34  ;;  %v470_v44 = vmul.f32 %v433_v24, %v383_v37  ;;  %v474_v45 = vmul.f32 %v453_v28, %v399_v39 }
 0x107   : > { %v754_v46 = vpop.f32.mrf.mxu0  ;;  %v758_v48 = vpop.f32.mrf.mxu1 }
 0x108   : > { %488 = vst [vmem:[#allocation2 + $0x18] sm:$0xff] %v480_v42  ;;  %492 = vst [vmem:[#allocation2 + $0x28] sm:$0xff] %v484_v43  ;;  %v478_v50 = vadd.f32 %v470_v44, %v414_v38  ;;  %v482_v51 = vadd.f32 %v474_v45, %v418_v40  ;;  %v473_v52 = vmul.f32 %v754_v46, %v448_v27 }
 0x109   : > { %v477_v53 = vmul.f32 %v758_v48, %v468_v41  ;;  %v386_v54 = vpop.f32.mrf.mxu0  ;;  %v402_v56 = vpop.f32.mrf.mxu1 }
 0x10a   : > { %486 = vst [vmem:[#allocation2 + $0x30] sm:$0xff] %v478_v50  ;;  %490 = vst [vmem:[#allocation2 + $0x8] sm:$0xff] %v482_v51  ;;  %v481_v58 = vadd.f32 %v473_v52, %v417_v47  ;;  %v471_v60 = vmul.f32 %v438_v26, %v386_v54  ;;  %v475_v61 = vmul.f32 %v458_v29, %v402_v56  ;;  %497 = sbr.rel (%p679_p9) target bundleno = 284 (0x11c), region = 44 }
 0x10b   : > { %v485_v59 = vadd.f32 %v477_v53, %v421_v49 }
 0x10c   : > { %489 = vst [vmem:[#allocation2 + $0x10] sm:$0xff] %v481_v58  ;;  %v479_v62 = vadd.f32 %v471_v60, %v415_v55  ;;  %v483_v63 = vadd.f32 %v475_v61, %v419_v57 }
 0x10d   : > { %493 = vst [vmem:[#allocation2 + $0x38] sm:$0xff] %v485_v59 }
 0x10e   : > { %487 = vst [vmem:[#allocation2] sm:$0xff] %v479_v62  ;;  %491 = vst [vmem:[#allocation2 + $0x20] sm:$0xff] %v483_v63 }
 0x10f   : > { %v680_v2 = vld [vmem:[%s998_s3] ss:$0 sm:$0xff]  ;;  %v500_v5 = vld [vmem:[#allocation2 + $0x18] sm:$0xff]  ;;  %v504_v12 = vld [vmem:[#allocation2 + $0x28] sm:$0xff] }
 0x110   : > { %v515_v8 = vadd.f32 %v680_v2, %v500_v5  ;;  %v519_v16 = vadd.f32 %v680_v2, %v504_v12 }
 0x111   : > { %v498_v0 = vld [vmem:[#allocation2 + $0x30] sm:$0xff]  ;;  %v502_v7 = vld [vmem:[#allocation2 + $0x8] sm:$0xff] }
 0x112   : > { %v513_v3 = vadd.f32 %v680_v2, %v498_v0  ;;  %v517_v11 = vadd.f32 %v680_v2, %v502_v7 }
 0x113   : > { %v501_v6 = vld [vmem:[#allocation2 + $0x10] sm:$0xff] }
 0x114   : > { %v516_v9 = vadd.f32 %v680_v2, %v501_v6  ;;  %v505_v13 = vld [vmem:[#allocation2 + $0x38] sm:$0xff] }
 0x115   : > { %v499_v1 = vld [vmem:[#allocation2] sm:$0xff]  ;;  %v520_v17 = vadd.f32 %v680_v2, %v505_v13 }
 0x116   : > { %v514_v4 = vadd.f32 %v680_v2, %v499_v1  ;;  %v503_v10 = vld [vmem:[#allocation2 + $0x20] sm:$0xff]  ;;  %v708_v18 = vpack.c.bf16 %v516_v9, %v515_v8 }
 0x117   : > { %v518_v15 = vadd.f32 %v680_v2, %v503_v10  ;;  %v718_v20 = vpack.c.bf16 %v520_v17, %v519_v16 }
 0x118   : > { %v703_v14 = vpack.c.bf16 %v514_v4, %v513_v3  ;;  %720 = vst [vmem:[%s934_s11 + $0x8] sm:$0xff] %v708_v18  }
 0x119   : > { %v713_v19 = vpack.c.bf16 %v518_v15, %v517_v11  ;;  %722 = vst [vmem:[%s934_s11 + $0x18] sm:$0xff] %v718_v20  }
 0x11a   : > { %704 = vst [vmem:[%s934_s11] sm:$0xff] %v703_v14  }
 0x11b   : > { %721 = vst [vmem:[%s934_s11 + $0x10] sm:$0xff] %v713_v19  }
 0x11c PF: > { %s14_s19 = sadd.s32 1, %s865_s19   ;;  %s1000_s15 = smov %s857_s17 }
 0x11d   : > { %p11_p10 = scmp.ge.s32.totalorder %s14_s19, 8   ;;  %s1001_s16 = smov %s861_s18 }
 0x11e   : > { %s1002_s17 = smov %s1005_s20  ;;  %s1003_s18 = smov %s1009_s21 }
 0x11f   :  { %13 = sbr.rel (!%p11_p10) target bundleno = 3 (0x3), region = 78 }

</bundles_post_ra>
